<compile_context>
chip_gen: v6e
topology: v6e:2x2x1
jax: 0.10.0
libtpu: 0.0.40
codegen_flags: <defaults>
</compile_context>

<pallas_src>
import functools

import jax
import jax.numpy as jnp
from jax.experimental import pallas as pl
from jax.experimental.pallas import tpu as pltpu

EPS = 1e-5
LANE = 128
VMEM_LIMIT = 32 * 1024 * 1024  # conservative: fits v7x's 64 MiB physical VMEM


# ------------------------------ small helpers -------------------------------

def _round_up(x, m):
    return ((x + m - 1) // m) * m


def _pick_tm(m, target):
    """Largest multiple of 8 <= target that evenly divides m (else full m)."""
    cap = min(target, m)
    cap -= cap % 8
    for tm in range(cap, 0, -8):
        if m % tm == 0:
            return tm
    return m


def _tile_spec(tm, c):
    return pl.BlockSpec((tm, c), lambda m: (m, 0))


def _rep_spec(r, c):
    return pl.BlockSpec((r, c), lambda m: (0, 0))


def _cparams(semantics):
    return pltpu.CompilerParams(dimension_semantics=semantics,
                                vmem_limit_bytes=VMEM_LIMIT)


def _bn_from_stats(y, ssum, ssq, g, b, inv_m):
    mean = ssum * inv_m
    var = jnp.maximum(ssq * inv_m - mean * mean, 0.0)   # single-pass, f32 accum
    return (y - mean) * jax.lax.rsqrt(var + EPS) * g + b


# ----------------------------- Pallas kernels -------------------------------

def _conv_stats_kernel(p_ref, w_ref, y_ref, ssum_ref, ssq_ref):
    """y = patches @ W (bf16 in, f32 acc); accumulate per-channel sum/sumsq."""
    y = jnp.dot(p_ref[...], w_ref[...], preferred_element_type=jnp.float32)
    y_ref[...] = y

    @pl.when(pl.program_id(0) == 0)
    def _init():
        ssum_ref[...] = jnp.zeros_like(ssum_ref)
        ssq_ref[...] = jnp.zeros_like(ssq_ref)

    ssum_ref[...] += jnp.sum(y, axis=0, keepdims=True)
    ssq_ref[...] += jnp.sum(y * y, axis=0, keepdims=True)


def _dual_conv_stats_kernel(p2_ref, w2_ref, ps_ref, ws_ref,
                            y2_ref, s2sum_ref, s2sq_ref, sssum_ref, sssq_ref):
    """conv2 matmul + stats, with the tiny 1x1 shortcut matmul riding the same
    pass so its BN statistics are available for the fused finalize kernel."""
    y2 = jnp.dot(p2_ref[...], w2_ref[...], preferred_element_type=jnp.float32)
    ys = jnp.dot(ps_ref[...], ws_ref[...], preferred_element_type=jnp.float32)
    y2_ref[...] = y2

    @pl.when(pl.program_id(0) == 0)
    def _init():
        s2sum_ref[...] = jnp.zeros_like(s2sum_ref)
        s2sq_ref[...] = jnp.zeros_like(s2sq_ref)
        sssum_ref[...] = jnp.zeros_like(sssum_ref)
        sssq_ref[...] = jnp.zeros_like(sssq_ref)

    s2sum_ref[...] += jnp.sum(y2, axis=0, keepdims=True)
    s2sq_ref[...] += jnp.sum(y2 * y2, axis=0, keepdims=True)
    sssum_ref[...] += jnp.sum(ys, axis=0, keepdims=True)
    sssq_ref[...] += jnp.sum(ys * ys, axis=0, keepdims=True)


def _bn_relu_kernel(y_ref, ssum_ref, ssq_ref, g_ref, b_ref, o_ref, *, inv_m):
    out = _bn_from_stats(y_ref[...], ssum_ref[...], ssq_ref[...],
                         g_ref[...], b_ref[...], inv_m)
    o_ref[...] = jnp.maximum(out, 0.0).astype(o_ref.dtype)


def _finalize_proj_kernel(y2_ref, s2sum_ref, s2sq_ref, g2_ref, b2_ref,
                          ps_ref, ws_ref, sssum_ref, sssq_ref, gs_ref, bs_ref,
                          o_ref, *, inv_m):
    """BN(conv2) + BN(shortcut conv, recomputed in-kernel) + add + ReLU."""
    ys = jnp.dot(ps_ref[...], ws_ref[...], preferred_element_type=jnp.float32)
    out = _bn_from_stats(y2_ref[...], s2sum_ref[...], s2sq_ref[...],
                         g2_ref[...], b2_ref[...], inv_m)
    out = out + _bn_from_stats(ys, sssum_ref[...], sssq_ref[...],
                               gs_ref[...], bs_ref[...], inv_m)
    o_ref[...] = jnp.maximum(out, 0.0).astype(o_ref.dtype)


def _finalize_id_kernel(y2_ref, s2sum_ref, s2sq_ref, g2_ref, b2_ref, r_ref,
                        o_ref, *, inv_m):
    """BN(conv2) + identity residual + ReLU."""
    out = _bn_from_stats(y2_ref[...], s2sum_ref[...], s2sq_ref[...],
                         g2_ref[...], b2_ref[...], inv_m)
    out = out + r_ref[...].astype(jnp.float32)
    o_ref[...] = jnp.maximum(out, 0.0).astype(o_ref.dtype)


# --------------------------- pallas_call wrappers ----------------------------

def conv_stats(patches, wmat, tm):
    M, K = patches.shape
    Cp = wmat.shape[1]
    return pl.pallas_call(
        _conv_stats_kernel,
        out_shape=(jax.ShapeDtypeStruct((M, Cp), jnp.float32),
                   jax.ShapeDtypeStruct((1, Cp), jnp.float32),
                   jax.ShapeDtypeStruct((1, Cp), jnp.float32)),
        grid=(M // tm,),
        in_specs=[_tile_spec(tm, K), _rep_spec(K, Cp)],
        out_specs=(_tile_spec(tm, Cp), _rep_spec(1, Cp), _rep_spec(1, Cp)),
        compiler_params=_cparams(("arbitrary",)),
    )(patches, wmat)


def dual_conv_stats(p2, w2, ps, ws, tm):
    M, K2 = p2.shape
    Ks = ps.shape[1]
    Cp = w2.shape[1]
    return pl.pallas_call(
        _dual_conv_stats_kernel,
        out_shape=(jax.ShapeDtypeStruct((M, Cp), jnp.float32),
                   jax.ShapeDtypeStruct((1, Cp), jnp.float32),
                   jax.ShapeDtypeStruct((1, Cp), jnp.float32),
                   jax.ShapeDtypeStruct((1, Cp), jnp.float32),
                   jax.ShapeDtypeStruct((1, Cp), jnp.float32)),
        grid=(M // tm,),
        in_specs=[_tile_spec(tm, K2), _rep_spec(K2, Cp),
                  _tile_spec(tm, Ks), _rep_spec(Ks, Cp)],
        out_specs=(_tile_spec(tm, Cp), _rep_spec(1, Cp), _rep_spec(1, Cp),
                   _rep_spec(1, Cp), _rep_spec(1, Cp)),
        compiler_params=_cparams(("arbitrary",)),
    )(p2, w2, ps, ws)


def bn_relu_apply(y, ssum, ssq, g, b, tm, out_dtype=jnp.bfloat16):
    M, Cp = y.shape
    kernel = functools.partial(_bn_relu_kernel, inv_m=1.0 / M)
    return pl.pallas_call(
        kernel,
        out_shape=jax.ShapeDtypeStruct((M, Cp), out_dtype),
        grid=(M // tm,),
        in_specs=[_tile_spec(tm, Cp), _rep_spec(1, Cp), _rep_spec(1, Cp),
                  _rep_spec(1, Cp), _rep_spec(1, Cp)],
        out_specs=_tile_spec(tm, Cp),
        compiler_params=_cparams(("parallel",)),
    )(y, ssum, ssq, g, b)


def finalize_proj(y2, s2sum, s2sq, g2, b2, ps, ws, sssum, sssq, gs, bs, tm):
    M, Cp = y2.shape
    Ks = ps.shape[1]
    kernel = functools.partial(_finalize_proj_kernel, inv_m=1.0 / M)
    return pl.pallas_call(
        kernel,
        out_shape=jax.ShapeDtypeStruct((M, Cp), jnp.float32),
        grid=(M // tm,),
        in_specs=[_tile_spec(tm, Cp),
                  _rep_spec(1, Cp), _rep_spec(1, Cp),
                  _rep_spec(1, Cp), _rep_spec(1, Cp),
                  _tile_spec(tm, Ks), _rep_spec(Ks, Cp),
                  _rep_spec(1, Cp), _rep_spec(1, Cp),
                  _rep_spec(1, Cp), _rep_spec(1, Cp)],
        out_specs=_tile_spec(tm, Cp),
        compiler_params=_cparams(("parallel",)),
    )(y2, s2sum, s2sq, g2, b2, ps, ws, sssum, sssq, gs, bs)


def finalize_identity(y2, s2sum, s2sq, g2, b2, r, tm):
    M, Cp = y2.shape
    kernel = functools.partial(_finalize_id_kernel, inv_m=1.0 / M)
    return pl.pallas_call(
        kernel,
        out_shape=jax.ShapeDtypeStruct((M, Cp), jnp.float32),
        grid=(M // tm,),
        in_specs=[_tile_spec(tm, Cp),
                  _rep_spec(1, Cp), _rep_spec(1, Cp),
                  _rep_spec(1, Cp), _rep_spec(1, Cp),
                  _tile_spec(tm, Cp)],
        out_specs=_tile_spec(tm, Cp),
        compiler_params=_cparams(("parallel",)),
    )(y2, s2sum, s2sq, g2, b2, r)


# -------------------------------- JAX glue -----------------------------------

def im2col(x_nhwc, ksize, stride, padding):
    """Extract conv patches. Returns ((N*Ho*Wo, k*k*C), Ho, Wo)."""
    N, H, W, C = x_nhwc.shape
    Ho = (H + 2 * padding - ksize) // stride + 1
    Wo = (W + 2 * padding - ksize) // stride + 1
    xp = jnp.pad(x_nhwc, ((0, 0), (padding, padding), (padding, padding), (0, 0)))
    taps = []
    for i in range(ksize):
        for j in range(ksize):
            taps.append(jax.lax.slice(
                xp, (0, i, j, 0),
                (N, i + (Ho - 1) * stride + 1, j + (Wo - 1) * stride + 1, C),
                (1, stride, stride, 1)))
    patches = jnp.stack(taps, axis=3)                       # (N, Ho, Wo, k*k, C)
    return patches.reshape(N * Ho * Wo, ksize * ksize * C), Ho, Wo


def w_oihw_to_mat(w):
    """PyTorch (Cout, Cin, kh, kw) -> (kh*kw*Cin, Cout) matching im2col order."""
    Cout, Cin, kh, kw = w.shape
    return jnp.transpose(w, (2, 3, 1, 0)).reshape(kh * kw * Cin, Cout)


def _pad_cols(mat, cp):
    return jnp.pad(mat, ((0, 0), (0, cp - mat.shape[1])))


def _pad_vec(v, cp):
    return jnp.pad(v, (0, cp - v.shape[0])).reshape(1, cp).astype(jnp.float32)


def residual_block_forward(x_nchw, params, stride, target_tm=512):
    N, Cin, H, W = x_nchw.shape
    Cout = params["w1"].shape[0]
    Cp = _round_up(Cout, LANE)                    # lane-dense channel axis
    x = jnp.transpose(x_nchw, (0, 2, 3, 1)).astype(jnp.float32)   # NHWC
    x_bf = x.astype(jnp.bfloat16)                 # bf16 MXU inputs

    # --- conv1 (3x3, stride) + BN stats -> apply BN + ReLU -------------------
    p1, Ho, Wo = im2col(x_bf, 3, stride, 1)
    M = N * Ho * Wo
    tm = _pick_tm(M, target_tm)

    w1 = _pad_cols(w_oihw_to_mat(params["w1"]), Cp).astype(jnp.bfloat16)
    g1, b1 = _pad_vec(params["g1"], Cp), _pad_vec(params["b1"], Cp)
    y1, s1sum, s1sq = conv_stats(p1, w1, tm)
    a1 = bn_relu_apply(y1, s1sum, s1sq, g1, b1, tm)          # (M, Cp) bf16

    # --- conv2 (3x3, stride 1) patches ---------------------------------------
    a1_nhwc = a1[:, :Cout].reshape(N, Ho, Wo, Cout)
    p2, _, _ = im2col(a1_nhwc, 3, 1, 1)
    w2 = _pad_cols(w_oihw_to_mat(params["w2"]), Cp).astype(jnp.bfloat16)
    g2, b2 = _pad_vec(params["g2"], Cp), _pad_vec(params["b2"], Cp)

    if stride != 1 or Cin != Cout:
        # projection shortcut: 1x1 conv + BN, fused into the finalize kernel
        ps, _, _ = im2col(x_bf, 1, stride, 0)
        ws = _pad_cols(w_oihw_to_mat(params["ws"]), Cp).astype(jnp.bfloat16)
        gs, bs = _pad_vec(params["gs"], Cp), _pad_vec(params["bs"], Cp)
        y2, s2sum, s2sq, sssum, sssq = dual_conv_stats(p2, w2, ps, ws, tm)
        out = finalize_proj(y2, s2sum, s2sq, g2, b2,
                            ps, ws, sssum, sssq, gs, bs, tm)
    else:
        # identity shortcut
        r = jnp.pad(x.reshape(M, Cin), ((0, 0), (0, Cp - Cin)))
        y2, s2sum, s2sq = conv_stats(p2, w2, tm)
        out = finalize_identity(y2, s2sum, s2sq, g2, b2, r, tm)

    out = out[:, :Cout].reshape(N, Ho, Wo, Cout)
    return jnp.transpose(out, (0, 3, 1, 2))                   # NCHW


# ---------------------------- pure-JAX reference ------------------------------

def reference_forward(x, params, stride):
    def conv(x, w, s, p):
        return jax.lax.conv_general_dilated(
            x, w, (s, s), [(p, p), (p, p)],
            dimension_numbers=("NCHW", "OIHW", "NCHW"))

    def bn(y, g, b):
        mean = jnp.mean(y, axis=(0, 2, 3), keepdims=True)
        var = jnp.mean((y - mean) ** 2, axis=(0, 2, 3), keepdims=True)
        return ((y - mean) / jnp.sqrt(var + EPS)
                * g.reshape(1, -1, 1, 1) + b.reshape(1, -1, 1, 1))

    Cout, Cin = params["w1"].shape[0], params["w1"].shape[1]
    left = jnp.maximum(bn(conv(x, params["w1"], stride, 1),
                          params["g1"], params["b1"]), 0.0)
    left = bn(conv(left, params["w2"], 1, 1), params["g2"], params["b2"])
    if stride != 1 or Cin != Cout:
        sc = bn(conv(x, params["ws"], stride, 0), params["gs"], params["bs"])
    else:
        sc = x
    return jnp.maximum(left + sc, 0.0)


# ----------------------------------- main -------------------------------------

def make_params(key, cin, cout, proj):
    ks = jax.random.split(key, 9)
    p = {
        "w1": jax.random.normal(ks[0], (cout, cin, 3, 3), jnp.float32) / jnp.sqrt(9.0 * cin),
        "g1": 1.0 + 0.1 * jax.random.normal(ks[1], (cout,), jnp.float32),
        "b1": 0.1 * jax.random.normal(ks[2], (cout,), jnp.float32),
        "w2": jax.random.normal(ks[3], (cout, cout, 3, 3), jnp.float32) / jnp.sqrt(9.0 * cout),
        "g2": 1.0 + 0.1 * jax.random.normal(ks[4], (cout,), jnp.float32),
        "b2": 0.1 * jax.random.normal(ks[5], (cout,), jnp.float32),
    }
    if proj:
        p.update({
            "ws": jax.random.normal(ks[6], (cout, cin, 1, 1), jnp.float32) / jnp.sqrt(1.0 * cin),
            "gs": 1.0 + 0.1 * jax.random.normal(ks[7], (cout,), jnp.float32),
            "bs": 0.1 * jax.random.normal(ks[8], (cout,), jnp.float32),
        })
    return p


if __name__ == "__main__":
    key = jax.random.PRNGKey(0)
    k1, k2, k3, k4 = jax.random.split(key, 4)

    # target_tm=128 is intentionally small so the toy shapes exercise the
    # multi-tile cross-tile BN-stats accumulation; production sizes would use
    # 512-1024 rows per step.

    # Case 1: projection shortcut (stride != 1, Cin != Cout).
    N, Cin, H, W, Cout, stride = 2, 4, 16, 16, 8, 2
    x = jax.random.normal(k1, (N, Cin, H, W), jnp.float32)
    params = make_params(k2, Cin, Cout, proj=True)
    out = jax.block_until_ready(residual_block_forward(x, params, stride, target_tm=128))
    ref = jax.block_until_ready(reference_forward(x, params, stride))
    assert out.shape == (N, Cout, H // stride, W // stride), out.shape
    err = float(jnp.max(jnp.abs(out - ref)))
    assert err < 5e-2, f"projection path: max abs err too large: {err}"

    # Case 2: identity shortcut (stride == 1, Cin == Cout); M=512 -> 4 M-tiles.
    N, Cin, H, W, Cout, stride = 2, 8, 16, 16, 8, 1
    x = jax.random.normal(k3, (N, Cin, H, W), jnp.float32)
    params = make_params(k4, Cin, Cout, proj=False)
    out = jax.block_until_ready(residual_block_forward(x, params, stride, target_tm=128))
    ref = jax.block_until_ready(reference_forward(x, params, stride))
    assert out.shape == (N, Cout, H, W), out.shape
    err = float(jnp.max(jnp.abs(out - ref)))
    assert err < 5e-2, f"identity path: max abs err too large: {err}"

    print("KERNEL_OK")
</pallas_src>

<mosaic_0001>
module attributes {stable_mosaic.version = 11 : i64} {
  func.func @_conv_stats_kernel(%arg0: i32, %arg1: memref<128x36xbf16, #tpu.memory_space<vmem>>, %arg2: memref<36x128xbf16, #tpu.memory_space<vmem>>, %arg3: memref<128x128xf32, #tpu.memory_space<vmem>>, %arg4: memref<1x128xf32, #tpu.memory_space<vmem>>, %arg5: memref<1x128xf32, #tpu.memory_space<vmem>>) attributes {dimension_semantics = [#tpu.dimension_semantics<arbitrary>], iteration_bounds = array<i64: 1>, scalar_prefetch = 0 : i64, scratch_operands = 0 : i64, tpu.core_type = #tpu.core_type<tc>, window_params = [{transform_indices = @transform_0, window_bounds = array<i64: 128, 36>}, {pipeline_mode = #tpu.pipeline_mode<synchronous>, transform_indices = @transform_1, window_bounds = array<i64: 36, 128>}, {transform_indices = @transform_2, window_bounds = array<i64: 128, 128>}, {pipeline_mode = #tpu.pipeline_mode<synchronous>, transform_indices = @transform_3, window_bounds = array<i64: 1, 128>}, {pipeline_mode = #tpu.pipeline_mode<synchronous>, transform_indices = @transform_4, window_bounds = array<i64: 1, 128>}]} {
    %c0 = arith.constant 0 : index
    %c0_0 = arith.constant 0 : index
    %0 = vector.load %arg1[%c0, %c0_0] : memref<128x36xbf16, #tpu.memory_space<vmem>>, vector<128x36xbf16>
    %c0_1 = arith.constant 0 : index
    %c0_2 = arith.constant 0 : index
    %1 = vector.load %arg2[%c0_1, %c0_2] : memref<36x128xbf16, #tpu.memory_space<vmem>>, vector<36x128xbf16>
    %cst = arith.constant dense<0.000000e+00> : vector<128x128xf32>
    %2 = tpu.matmul %0, %1, %cst {dimension_numbers = #tpu.dot_dimension_numbers<[1], [0], [0], [1], [0, 0, 1, 1], [], []>} : vector<128x36xbf16>, vector<36x128xbf16>, vector<128x128xf32> -> vector<128x128xf32>
    %c0_3 = arith.constant 0 : index
    %c0_4 = arith.constant 0 : index
    %3 = vector.load %arg3[%c0_3, %c0_4] : memref<128x128xf32, #tpu.memory_space<vmem>>, vector<128x128xf32>
    tpu.vector_store %arg3[%c0_3, %c0_4], %2 {strides = array<i32>} : memref<128x128xf32, #tpu.memory_space<vmem>>, vector<128x128xf32>,
    %c0_i32 = arith.constant 0 : i32
    %4 = arith.cmpi eq, %arg0, %c0_i32 : i32
    %5 = arith.extui %4 : i1 to i32
    %c0_i32_5 = arith.constant 0 : i32
    %6 = arith.cmpi ne, %5, %c0_i32_5 : i32
    scf.if %6 {
      %cst_16 = arith.constant 0.000000e+00 : f32
      %18 = vector.broadcast %cst_16 : f32 to vector<1x128xf32>
      %c0_17 = arith.constant 0 : index
      %c0_18 = arith.constant 0 : index
      %19 = vector.load %arg4[%c0_17, %c0_18] : memref<1x128xf32, #tpu.memory_space<vmem>>, vector<1x128xf32>
      tpu.vector_store %arg4[%c0_17, %c0_18], %18 {strides = array<i32>} : memref<1x128xf32, #tpu.memory_space<vmem>>, vector<1x128xf32>,
      %cst_19 = arith.constant 0.000000e+00 : f32
      %20 = vector.broadcast %cst_19 : f32 to vector<1x128xf32>
      %c0_20 = arith.constant 0 : index
      %c0_21 = arith.constant 0 : index
      %21 = vector.load %arg5[%c0_20, %c0_21] : memref<1x128xf32, #tpu.memory_space<vmem>>, vector<1x128xf32>
      tpu.vector_store %arg5[%c0_20, %c0_21], %20 {strides = array<i32>} : memref<1x128xf32, #tpu.memory_space<vmem>>, vector<1x128xf32>,
    } else {
    }
    %c0_6 = arith.constant 0 : index
    %c0_7 = arith.constant 0 : index
    %7 = vector.load %arg4[%c0_6, %c0_7] : memref<1x128xf32, #tpu.memory_space<vmem>>, vector<1x128xf32>
    %cst_8 = arith.constant dense<0.000000e+00> : vector<128xf32>
    %8 = vector.multi_reduction <add>, %2, %cst_8 [0] : vector<128x128xf32> to vector<128xf32>
    %9 = vector.shape_cast %8 : vector<128xf32> to vector<1x128xf32>
    %10 = arith.addf %7, %9 : vector<1x128xf32>
    %c0_9 = arith.constant 0 : index
    %c0_10 = arith.constant 0 : index
    %11 = vector.load %arg4[%c0_9, %c0_10] : memref<1x128xf32, #tpu.memory_space<vmem>>, vector<1x128xf32>
    tpu.vector_store %arg4[%c0_9, %c0_10], %10 {strides = array<i32>} : memref<1x128xf32, #tpu.memory_space<vmem>>, vector<1x128xf32>,
    %c0_11 = arith.constant 0 : index
    %c0_12 = arith.constant 0 : index
    %12 = vector.load %arg5[%c0_11, %c0_12] : memref<1x128xf32, #tpu.memory_space<vmem>>, vector<1x128xf32>
    %13 = arith.mulf %2, %2 : vector<128x128xf32>
    %cst_13 = arith.constant dense<0.000000e+00> : vector<128xf32>
    %14 = vector.multi_reduction <add>, %13, %cst_13 [0] : vector<128x128xf32> to vector<128xf32>
    %15 = vector.shape_cast %14 : vector<128xf32> to vector<1x128xf32>
    %16 = arith.addf %12, %15 : vector<1x128xf32>
    %c0_14 = arith.constant 0 : index
    %c0_15 = arith.constant 0 : index
    %17 = vector.load %arg5[%c0_14, %c0_15] : memref<1x128xf32, #tpu.memory_space<vmem>>, vector<1x128xf32>
    tpu.vector_store %arg5[%c0_14, %c0_15], %16 {strides = array<i32>} : memref<1x128xf32, #tpu.memory_space<vmem>>, vector<1x128xf32>,
    return
  }
  func.func @transform_0(%arg0: i32) -> (i32, i32) {
    %c0_i32 = arith.constant 0 : i32
    %c0_i32_0 = arith.constant 0 : i32
    return %arg0, %c0_i32 : i32, i32
  }
  func.func @transform_1(%arg0: i32) -> (i32, i32) {
    %c0_i32 = arith.constant 0 : i32
    %c0_i32_0 = arith.constant 0 : i32
    %c0_i32_1 = arith.constant 0 : i32
    return %c0_i32, %c0_i32_0 : i32, i32
  }
  func.func @transform_2(%arg0: i32) -> (i32, i32) {
    %c0_i32 = arith.constant 0 : i32
    %c0_i32_0 = arith.constant 0 : i32
    return %arg0, %c0_i32 : i32, i32
  }
  func.func @transform_3(%arg0: i32) -> (i32, i32) {
    %c0_i32 = arith.constant 0 : i32
    %c0_i32_0 = arith.constant 0 : i32
    %c0_i32_1 = arith.constant 0 : i32
    return %c0_i32, %c0_i32_0 : i32, i32
  }
  func.func @transform_4(%arg0: i32) -> (i32, i32) {
    %c0_i32 = arith.constant 0 : i32
    %c0_i32_0 = arith.constant 0 : i32
    %c0_i32_1 = arith.constant 0 : i32
    return %c0_i32, %c0_i32_0 : i32, i32
  }
}

</mosaic_0001>

<bundles_post_ra>
// kernel: tpu_custom_call.1
= control target key start
LH: loop header
LB: loop body
LE: loop exit
PB: predicated region body
PF: predicated region fallthrough
CT: control target
= control target key end

     0   :  { %10 = vsyncpa [#allocation3], 0  ;;  %vm118_vm0 = vcmask 1041408   ;;  %vm93_vm1 = vcmask 293888   ;;  %s594_s0 = inlined_call_operand.vmem [shape: bf16[128,36], index: 0, kind: input, shape index: {}]   ;;  %s595_s1 = inlined_call_operand.vmem [shape: bf16[36,128], index: 1, kind: input, shape index: {}]   ;;  %s596_s2 = inlined_call_operand.hbm [shape: f32[128,128], index: 2, kind: output, shape index: {0}]   ;;  %s597_s3 = inlined_call_operand.hbm [shape: f32[1,128], index: 3, kind: output, shape index: {1}]   ;;  %s598_s4 = inlined_call_operand.hbm [shape: f32[1,128], index: 4, kind: output, shape index: {2}]  }
   0x1   :  { %v414_v0 = vld [vmem:[%s595_s1 + $0x10] ss:$0 sps:$4 sm:$0x33]   ;;  %v415_v1 = vld [vmem:[%s595_s1 + $0x8] sm:$0xff]   ;;  %v417_v3 = vld [vmem:[%s594_s0] sm:$0xff]  }
   0x2   :  { %406 = vmatprep.subr.msk.bf16.mxu0 %vm118_vm0, %v414_v0  ;;  %v120_v2 = vsel %vm118_vm0, %v414_v0, 0  ;;  %407 = vmatprep.subr.msk.bf16.mxu1 %vm118_vm0, %v414_v0  ;;  %v416_v4 = vld [vmem:[%s595_s1] sm:$0xff]   ;;  %v418_v6 = vld [vmem:[%s594_s0 + $0x8] sm:$0xff]   ;;  %v419_v8 = vld [vmem:[%s594_s0 + $0x10] sm:$0xff]  }
   0x3   :  { %379 = vmatpush3.bf16.msra.mxu0 %v120_v2  ;;  %403 = vmatpush3.bf16.msra.mxu1 %v120_v2  ;;  %v421_v5 = vld [vmem:[%s594_s0 + $0x20] sm:$0xff]   ;;  %v422_v7 = vld [vmem:[%s594_s0 + $0x28] sm:$0xff]   ;;  %v423_v9 = vld [vmem:[%s594_s0 + $0x30] sm:$0xff]  }
   0x4   :  { %380 = vmatprep.subr.bf16.mxu0 %v415_v1  ;;  %401 = vmatprep.subr.bf16.mxu1 %v415_v1 }
   0x5   :  { %384 = vmatprep.mubr.msk.bf16.mxu0 %vm93_vm1, %v417_v3  ;;  %392 = vmatprep.mubr.msk.bf16.mxu1 %vm93_vm1, %v421_v5 }
   0x7   :  { %381 = vmatpush3.bf16.msra.mxu0 %v415_v1  ;;  %404 = vmatpush3.bf16.msra.mxu1 %v415_v1 }
   0x8   :  { %382 = vmatprep.subr.bf16.mxu0 %v416_v4  ;;  %402 = vmatprep.subr.bf16.mxu1 %v416_v4 }
   0xb   :  { %383 = vmatpush3.bf16.msra.mxu0 %v416_v4  ;;  %405 = vmatpush3.bf16.msra.mxu1 %v416_v4 }
   0xc   :  { %11 = vsyncpa [#allocation5], 0  ;;  %v420_v10 = vld [vmem:[%s594_s0 + $0x18] sm:$0xff]   ;;  %v489_v12 = vmov 0.0  }
   0xd   :  { %v424_v11 = vld [vmem:[%s594_s0 + $0x38] sm:$0xff]   ;;  %239 = vst [vmem:[#allocation4] sm:$0x1] %v489_v12  ;;  %240 = vst [vmem:[#allocation6] sm:$0x1] %v489_v12  ;;  %s490_s0 = smov [#allocation2]  }
   0xe   :  { %385 = vmatmul.mubr.msk.bf16.vlgmr.msra.gmra.mxu0 %vm93_vm1, %v418_v6  ;;  %393 = vmatmul.mubr.msk.bf16.vlgmr.msra.gmra.mxu1 %vm93_vm1, %v422_v7  ;;  %s310_s10 = sshll.u32 %s490_s0, 4  ;;  %s311_s10 = int_to_ptr.vmem [resolvable:$true] %s310_s10 }
   0xf   :  { %388 = vmatprep.mubr.msk.bf16.mxu0 %vm93_vm1, %v419_v8  ;;  %396 = vmatprep.mubr.msk.bf16.mxu1 %vm93_vm1, %v423_v9  ;;  %s425_s11 = scalar_lea.vmem %s311_s10, 2048  ;;  %p430_p1 = scmp.lt.s32.totalorder %s311_s10, %s311_s10 }
  0x10   :  { %p426_p0 = scmp.ne.s32.totalorder %s311_s10, %s425_s11  ;;  %p431_p2 = scmp.lt.s32.totalorder %s425_s11, %s425_s11 }
  0x12   :  { %p432_p3 = por %p431_p2, %p430_p1 }
  0x14   :  { %p433_p4 = pnand %p432_p3, %p426_p0 }
  0x16   :  { %389 = vmatmul.mubr.msk.bf16.gmra.mxu0 %vm93_vm1, %v420_v10  ;;  %397 = vmatmul.mubr.msk.bf16.gmra.mxu1 %vm93_vm1, %v424_v11 }
  0xce   :  { %v386_v13 = vpop.f32.mrf.mxu0  ;;  %v561_v14 = vpop.f32.mrf.mxu1 }
  0xcf   :  { %221 = vst [vmem:[#allocation2 + $0x10] sm:$0xff] %v386_v13  ;;  %229 = vst [vmem:[#allocation2 + $0x50] sm:$0xff] %v561_v14  ;;  %v268_v26 = vmul.f32 %v386_v13, %v386_v13 }
  0xd0   :  { %v156_v15 = vpop.f32.mrf.mxu0  ;;  %v564_v16 = vpop.f32.mrf.mxu1 }
  0xd1   :  { %219 = vst [vmem:[#allocation2] sm:$0xff] %v156_v15  ;;  %227 = vst [vmem:[#allocation2 + $0x40] sm:$0xff] %v564_v16  ;;  %v266_v21 = vmul.f32 %v156_v15, %v156_v15 }
  0xd2   :  { %v387_v17 = vpop.f32.mrf.mxu0  ;;  %v567_v18 = vpop.f32.mrf.mxu1 }
  0xd3   :  { %222 = vst [vmem:[#allocation2 + $0x18] sm:$0xff] %v387_v17  ;;  %230 = vst [vmem:[#allocation2 + $0x58] sm:$0xff] %v567_v18  ;;  %v269_v31 = vmul.f32 %v387_v17, %v387_v17 }
  0xd4   :  { %v159_v19 = vpop.f32.mrf.mxu0  ;;  %v191_v20 = vpop.f32.mrf.mxu1 }
  0xd5   :  { %220 = vst [vmem:[#allocation2 + $0x8] sm:$0xff] %v159_v19  ;;  %v242_v22 = vadd.f32 %v159_v19, %v156_v15  ;;  %v267_v23 = vmul.f32 %v159_v19, %v159_v19  ;;  %228 = vst [vmem:[#allocation2 + $0x48] sm:$0xff] %v191_v20 }
  0xd6   :  { %v390_v24 = vpop.f32.mrf.mxu0  ;;  %v570_v25 = vpop.f32.mrf.mxu1 }
  0xd7   :  { %v243_v27 = vadd.f32 %v386_v13, %v242_v22  ;;  %v282_v28 = vadd.f32 %v267_v23, %v266_v21  ;;  %225 = vst [vmem:[#allocation2 + $0x30] sm:$0xff] %v390_v24  ;;  %233 = vst [vmem:[#allocation2 + $0x70] sm:$0xff] %v570_v25 }
  0xd8   :  { %v172_v29 = vpop.f32.mrf.mxu0  ;;  %v204_v30 = vpop.f32.mrf.mxu1 }
  0xd9   :  { %v283_v32 = vadd.f32 %v282_v28, %v268_v26  ;;  %223 = vst [vmem:[#allocation2 + $0x20] sm:$0xff] %v172_v29  ;;  %v244_v33 = vadd.f32 %v387_v17, %v243_v27  ;;  %231 = vst [vmem:[#allocation2 + $0x60] sm:$0xff] %v204_v30  ;;  %v270_v37 = vmul.f32 %v172_v29, %v172_v29 }
  0xda   :  { %v391_v34 = vpop.f32.mrf.mxu0  ;;  %v399_v35 = vpop.f32.mrf.mxu1 }
  0xdb   :  { %v245_v36 = vadd.f32 %v244_v33, %v172_v29  ;;  %v284_v38 = vadd.f32 %v283_v32, %v269_v31  ;;  %226 = vst [vmem:[#allocation2 + $0x38] sm:$0xff] %v391_v34  ;;  %234 = vst [vmem:[#allocation2 + $0x78] sm:$0xff] %v399_v35 }
  0xdc   :  { %v175_v39 = vpop.f32.mrf.mxu0  ;;  %v207_v40 = vpop.f32.mrf.mxu1 }
  0xdd   :  { %v285_v41 = vadd.f32 %v284_v38, %v270_v37  ;;  %224 = vst [vmem:[#allocation2 + $0x28] sm:$0xff] %v175_v39  ;;  %v246_v42 = vadd.f32 %v245_v36, %v175_v39  ;;  %v271_v43 = vmul.f32 %v175_v39, %v175_v39  ;;  %232 = vst [vmem:[#allocation2 + $0x68] sm:$0xff] %v207_v40 }
  0xde   :  { %436 = shalt.err (!%p433_p4)
}
  0xdf   :  { %s491_s12 = smov 128   ;;  %s492_s13 = smov 8   ;;  %v272_v44 = vmul.f32 %v390_v24, %v390_v24  ;;  %v247_v45 = vadd.f32 %v390_v24, %v246_v42  ;;  %v286_v46 = vadd.f32 %v285_v41, %v271_v43  ;;  %v273_v47 = vmul.f32 %v391_v34, %v391_v34  ;;  %v265_v23 = vld [vmem:[#allocation6] sm:$0x1] }
  0xe0   :  { %316 = dma.vmem_to_hbm [thread:$0]  %s311_s10, 2048, %s596_s2, [#allocation3], %s491_s12, %s491_s12, %s492_s13   ;;  %v274_v50 = vmul.f32 %v564_v16, %v564_v16  ;;  %v275_v54 = vmul.f32 %v191_v20, %v191_v20  ;;  %v276_v56 = vmul.f32 %v561_v14, %v561_v14  ;;  %v277_v59 = vmul.f32 %v567_v18, %v567_v18 }
  0xe1   :  { %v248_v48 = vadd.f32 %v391_v34, %v247_v45  ;;  %v287_v49 = vadd.f32 %v286_v46, %v272_v44  ;;  %v278_v63 = vmul.f32 %v204_v30, %v204_v30  ;;  %v279_v3 = vmul.f32 %v207_v40, %v207_v40  ;;  %s493_s2 = smov [#allocation4]   ;;  %s494_s17 = smov [#allocation6]  }
  0xe2   :  { %v280_v4 = vmul.f32 %v570_v25, %v570_v25  ;;  %v281_v7 = vmul.f32 %v399_v35, %v399_v35  ;;  %s323_s16 = sshll.u32 %s493_s2, 4  ;;  %s333_s18 = sshll.u32 %s494_s17, 4  ;;  %s324_s16 = int_to_ptr.vmem [resolvable:$true] %s323_s16  ;;  %s334_s18 = int_to_ptr.vmem [resolvable:$true] %s333_s18 }
  0xe3   :  { %v288_v51 = vadd.f32 %v287_v49, %v273_v47  ;;  %v249_v52 = vadd.f32 %v248_v48, %v564_v16  ;;  %s445_s19 = scalar_lea.vmem %s324_s16, 16  ;;  %s449_s20 = scalar_lea.vmem %s324_s16, 32 }
  0xe4   :  { %p446_p5 = scmp.ne.s32.totalorder %s324_s16, %s445_s19  ;;  %p450_p6 = scmp.lt.s32.totalorder %s324_s16, %s324_s16 }
  0xe5   :  { %v250_v53 = vadd.f32 %v249_v52, %v191_v20  ;;  %v289_v55 = vadd.f32 %v288_v51, %v274_v50  ;;  %v241_v20 = vld [vmem:[#allocation4] sm:$0x1]  ;;  %p451_p7 = scmp.lt.s32.totalorder %s449_s20, %s445_s19 }
  0xe7   :  { %v251_v57 = vadd.f32 %v561_v14, %v250_v53  ;;  %v290_v58 = vadd.f32 %v289_v55, %v275_v54  ;;  %p452_p8 = por %p451_p7, %p450_p6 }
  0xe9   :  { %v291_v60 = vadd.f32 %v290_v58, %v276_v56  ;;  %v252_v61 = vadd.f32 %v567_v18, %v251_v57  ;;  %p453_p9 = pnand %p452_p8, %p446_p5 }
  0xeb   :  { %v253_v62 = vadd.f32 %v252_v61, %v204_v30  ;;  %v292_v0 = vadd.f32 %v291_v60, %v277_v59 }
  0xed   :  { %v293_v1 = vadd.f32 %v292_v0, %v278_v63  ;;  %v254_v2 = vadd.f32 %v253_v62, %v207_v40 }
  0xef   :  { %v255_v5 = vadd.f32 %v570_v25, %v254_v2  ;;  %v294_v6 = vadd.f32 %v293_v1, %v279_v3 }
  0xf1   :  { %v256_v8 = vadd.f32 %v399_v35, %v255_v5  ;;  %v295_v9 = vadd.f32 %v294_v6, %v280_v4 }
  0xf3   :  { %v257_v10 = vrot.slane %v256_v8, 4  ;;  %v296_v11 = vadd.f32 %v295_v9, %v281_v7 }
  0xf5   :  { %v258_v12 = vadd.f32 %v257_v10, %v256_v8  ;;  %v297_v13 = vrot.slane %v296_v11, 4 }
  0xf7   :  { %v259_v14 = vrot.slane %v258_v12, 2  ;;  %v298_v15 = vadd.f32 %v297_v13, %v296_v11 }
  0xf9   :  { %v260_v16 = vadd.f32 %v259_v14, %v258_v12  ;;  %v299_v17 = vrot.slane %v298_v15, 2 }
  0xfb   :  { %v261_v18 = vrot.slane %v260_v16, 1  ;;  %v300_v19 = vadd.f32 %v299_v17, %v298_v15 }
  0xfd   :  { %v262_v21 = vadd.f32 %v261_v18, %v260_v16  ;;  %v301_v22 = vrot.slane %v300_v19, 1 }
  0xff   :  { %v263_v24 = vadd.f32 %v262_v21, %v241_v20  ;;  %v302_v25 = vadd.f32 %v301_v22, %v300_v19 }
 0x101   :  { %264 = vst [vmem:[#allocation4] sm:$0x1] %v263_v24  ;;  %v303_v26 = vadd.f32 %v302_v25, %v265_v23 }
 0x102   :  { %456 = shalt.err (!%p453_p9)
}
 0x103   :  { %326 = dma.vmem_to_hbm [thread:$0]  %s324_s16, 16, %s597_s3, [#allocation5]   ;;  %304 = vst [vmem:[#allocation6] sm:$0x1] %v303_v26 }
 0x104   :  { %s465_s23 = scalar_lea.vmem %s334_s18, 16  ;;  %s469_s24 = scalar_lea.vmem %s334_s18, 32 }
 0x105   :  { %p466_p10 = scmp.ne.s32.totalorder %s334_s18, %s465_s23  ;;  %p470_p11 = scmp.lt.s32.totalorder %s334_s18, %s334_s18 }
 0x106   :  { %p471_p12 = scmp.lt.s32.totalorder %s469_s24, %s465_s23 }
 0x108   :  { %p472_p13 = por %p471_p12, %p470_p11 }
 0x10a   :  { %p473_p0 = pnand %p472_p13, %p466_p10 }
 0x10c   :  { %476 = shalt.err (!%p473_p0)
}
 0x10d   :  { %336 = dma.vmem_to_hbm [thread:$0]  %s334_s18, 16, %s598_s4, [#allocation5]  }
 0x10e   :  { %485 = dma.done.wait [#allocation3], 2048  }
 0x10f   :  { %486 = vsyncadd [#allocation3], 4294965248 }
 0x110   :  { %487 = dma.done.wait [#allocation5], 32  }
 0x111   :  { %488 = vsyncadd [#allocation5], 4294967264 }
 0x112   :  { %346 = vsyncpa [#allocation3], 1 }
 0x113   :  { %347 = vsyncpa [#allocation5], 1 }

</bundles_post_ra>
